<compile_context>
chip_gen: v7x
topology: tpu7x:2x2x1
jax: 0.10.0
libtpu: 0.0.40
codegen_flags: <defaults>
</compile_context>

<pallas_src>
import functools

import jax
import jax.numpy as jnp
from jax.experimental import pallas as pl
from jax.experimental.pallas import tpu as pltpu


def _ccbn_kernel(y_ref, x_ref, w_ref, b_ref, o_ref, *, eps):
    """One channel tile.

    y_ref : (N, K)        conditioning vectors (resident across the grid)
    x_ref : (N, T, HW)    activations for this channel tile
    w_ref : (1, K, 2*T)   packed [W_gain | W_bias] columns for this tile
    b_ref : (1, 1, 2*T)   packed [b_gain | b_bias] for this tile
    o_ref : (N, T, HW)
    """
    x = x_ref[...].astype(jnp.float32)                      # (N, T, HW)
    y = y_ref[...].astype(jnp.float32)                      # (N, K)

    # Fused conditioning matmul: one (under-filled) MXU pass instead of two.
    w = w_ref[0]                                            # (K, 2T)
    gb = jnp.dot(y, w, preferred_element_type=jnp.float32) + b_ref[0]  # (N, 2T)
    t = w.shape[1] // 2
    gain = 1.0 + gb[:, :t]                                  # (N, T)
    bias = gb[:, t:]                                        # (N, T)

    # Batch-norm stats per channel over (N, HW) -- biased variance, which is
    # what F.batch_norm uses for normalization in training mode.
    inv_n = 1.0 / float(x.shape[0] * x.shape[2])
    mean = jnp.sum(x, axis=(0, 2)) * inv_n                  # (T,)
    mean_sq = jnp.sum(x * x, axis=(0, 2)) * inv_n           # (T,)
    var = mean_sq - mean * mean
    scale = jax.lax.rsqrt(var + eps)                        # (T,)

    # Fold normalization + conditioning into a single affine per (N, T):
    #   out = (x - mean) * scale * gain + bias = x * a + b
    a = gain * scale[None, :]                               # (N, T)
    b = bias - mean[None, :] * a                            # (N, T)
    o_ref[...] = (x * a[:, :, None] + b[:, :, None]).astype(o_ref.dtype)


def _choose_c_tile(N, C, HW, in_bytes, out_bytes,
                   slab_budget_bytes=28 * 1024 * 1024):
    """Largest channel tile whose double-buffered x+out slabs fit the budget.

    Tile must be a multiple of 8 (sublane) or C itself so block shapes stay
    legal under the (8, 128) tiling rule.
    """
    per_chan = 2 * N * HW * (in_bytes + out_bytes)          # 2x: double-buffer
    max_t = max(1, slab_budget_bytes // per_chan)
    cands = [d for d in range(1, C + 1)
             if C % d == 0 and (d == C or d % 8 == 0)]
    fitting = [d for d in cands if d <= max_t]
    if fitting:
        return max(fitting)
    return min(cands)


def ccbn_forward(x, y, wg, bg, wb, bb, eps=1e-5, c_tile=None):
    """x: (N, C, H, W); y: (N, K); wg/wb: (C, K) torch Linear layout; bg/bb: (C,)."""
    N, C, H, W = x.shape
    K = y.shape[1]
    HW = H * W  # best kept a multiple of 128 so output stores stay lane-dense

    out_dtype = x.dtype
    if c_tile is None:
        c_tile = _choose_c_tile(N, C, HW,
                                jnp.dtype(x.dtype).itemsize,
                                jnp.dtype(out_dtype).itemsize)
    assert C % c_tile == 0 and (c_tile == C or c_tile % 8 == 0)
    n_tiles = C // c_tile

    x3 = x.reshape(N, C, HW)

    # Pack both Linear layers per channel tile: tile t -> [gain cols | bias cols].
    wg_t = wg.T.astype(jnp.float32).reshape(K, n_tiles, c_tile)
    wb_t = wb.T.astype(jnp.float32).reshape(K, n_tiles, c_tile)
    w_fused = jnp.transpose(jnp.concatenate([wg_t, wb_t], axis=2),
                            (1, 0, 2))                               # (n_tiles, K, 2T)
    bg_r = bg.astype(jnp.float32).reshape(n_tiles, 1, c_tile)
    bb_r = bb.astype(jnp.float32).reshape(n_tiles, 1, c_tile)
    b_fused = jnp.concatenate([bg_r, bb_r], axis=2)                  # (n_tiles, 1, 2T)

    itemsize = jnp.dtype(x.dtype).itemsize
    cost = pl.CostEstimate(
        flops=7 * N * C * HW + 4 * N * K * C,
        bytes_accessed=N * C * HW * (itemsize + jnp.dtype(out_dtype).itemsize),
        transcendentals=C,
    )

    out3 = pl.pallas_call(
        functools.partial(_ccbn_kernel, eps=eps),
        out_shape=jax.ShapeDtypeStruct((N, C, HW), out_dtype),
        grid=(n_tiles,),
        in_specs=[
            pl.BlockSpec((N, K), lambda c: (0, 0)),                  # y (resident)
            pl.BlockSpec((N, c_tile, HW), lambda c: (0, c, 0)),      # x channel tile
            pl.BlockSpec((1, K, 2 * c_tile), lambda c: (c, 0, 0)),   # fused weights
            pl.BlockSpec((1, 1, 2 * c_tile), lambda c: (c, 0, 0)),   # fused biases
        ],
        out_specs=pl.BlockSpec((N, c_tile, HW), lambda c: (0, c, 0)),
        compiler_params=pltpu.CompilerParams(
            dimension_semantics=("parallel",),
            vmem_limit_bytes=48 * 1024 * 1024,
        ),
        cost_estimate=cost,
    )(y, x3, w_fused, b_fused)
    return out3.reshape(N, C, H, W)


def ccbn_reference(x, y, wg, bg, wb, bb, eps=1e-5):
    """Pure-JAX reference mirroring the PyTorch forward."""
    gain = 1.0 + y @ wg.T + bg           # (N, C)
    bias = y @ wb.T + bb                 # (N, C)
    xf = x.astype(jnp.float32)
    mean = jnp.mean(xf, axis=(0, 2, 3), keepdims=True)
    var = jnp.mean(xf * xf, axis=(0, 2, 3), keepdims=True) - mean * mean
    x_hat = (xf - mean) * jax.lax.rsqrt(var + eps)
    out = x_hat * gain[:, :, None, None] + bias[:, :, None, None]
    return out.astype(x.dtype)


if __name__ == "__main__":
    key = jax.random.PRNGKey(0)
    N, C, H, W = 2, 16, 16, 16           # output_size = C = 16
    K = 8                                # input_size  = 8 (conditioning dim)

    kx, ky, kwg, kbg, kwb, kbb = jax.random.split(key, 6)
    x = jax.random.normal(kx, (N, C, H, W), dtype=jnp.float32)
    y = jax.random.normal(ky, (N, K), dtype=jnp.float32)

    # Deterministic "nn.Linear(input_size, output_size)" parameters.
    bound = 1.0 / (K ** 0.5)
    wg = jax.random.uniform(kwg, (C, K), minval=-bound, maxval=bound, dtype=jnp.float32)
    bg = jax.random.uniform(kbg, (C,), minval=-bound, maxval=bound, dtype=jnp.float32)
    wb = jax.random.uniform(kwb, (C, K), minval=-bound, maxval=bound, dtype=jnp.float32)
    bb = jax.random.uniform(kbb, (C,), minval=-bound, maxval=bound, dtype=jnp.float32)

    ref = ccbn_reference(x, y, wg, bg, wb, bb)

    # Exercise the channel-tiled grid explicitly (2 tiles of 8 channels) ...
    out_tiled = jax.block_until_ready(ccbn_forward(x, y, wg, bg, wb, bb, c_tile=8))
    # ... and the auto-tile path (picks the largest legal tile that fits VMEM).
    out_auto = jax.block_until_ready(ccbn_forward(x, y, wg, bg, wb, bb))

    assert out_tiled.shape == (N, C, H, W)
    assert jnp.allclose(out_tiled, ref, atol=1e-4, rtol=1e-4), "tiled mismatch vs reference"
    assert jnp.allclose(out_auto, ref, atol=1e-4, rtol=1e-4), "auto-tile mismatch vs reference"

    print("KERNEL_OK")
</pallas_src>

<mosaic_0001>
module attributes {stable_mosaic.version = 11 : i64} {
  func.func @_ccbn_kernel(%arg0: i32, %arg1: memref<2x8xf32, #tpu.memory_space<vmem>>, %arg2: memref<2x8x256xf32, #tpu.memory_space<vmem>>, %arg3: memref<1x8x16xf32, #tpu.memory_space<vmem>>, %arg4: memref<1x1x16xf32, #tpu.memory_space<vmem>>, %arg5: memref<2x8x256xf32, #tpu.memory_space<vmem>>) attributes {dimension_semantics = [#tpu.dimension_semantics<parallel>], iteration_bounds = array<i64: 2>, scalar_prefetch = 0 : i64, scratch_operands = 0 : i64, tpu.core_type = #tpu.core_type<tc>, window_params = [{pipeline_mode = #tpu.pipeline_mode<synchronous>, transform_indices = @transform_0, window_bounds = array<i64: 2, 8>}, {transform_indices = @transform_1, window_bounds = array<i64: 2, 8, 256>}, {transform_indices = @transform_2, window_bounds = array<i64: 1, 8, 16>}, {transform_indices = @transform_3, window_bounds = array<i64: 1, 1, 16>}, {transform_indices = @transform_4, window_bounds = array<i64: 2, 8, 256>}]} {
    %c0 = arith.constant 0 : index
    %c0_0 = arith.constant 0 : index
    %c0_1 = arith.constant 0 : index
    %0 = vector.load %arg2[%c0, %c0_0, %c0_1] : memref<2x8x256xf32, #tpu.memory_space<vmem>>, vector<2x8x256xf32>
    %c0_2 = arith.constant 0 : index
    %c0_3 = arith.constant 0 : index
    %1 = vector.load %arg1[%c0_2, %c0_3] : memref<2x8xf32, #tpu.memory_space<vmem>>, vector<2x8xf32>
    %c0_4 = arith.constant 0 : index
    %c0_5 = arith.constant 0 : index
    %c0_6 = arith.constant 0 : index
    %2 = vector.load %arg3[%c0_4, %c0_5, %c0_6] : memref<1x8x16xf32, #tpu.memory_space<vmem>>, vector<1x8x16xf32>
    %3 = vector.shape_cast %2 : vector<1x8x16xf32> to vector<8x16xf32>
    %cst = arith.constant dense<0.000000e+00> : vector<2x16xf32>
    %4 = tpu.matmul %1, %3, %cst {dimension_numbers = #tpu.dot_dimension_numbers<[1], [0], [0], [1], [0, 0, 1, 1], [], []>} : vector<2x8xf32>, vector<8x16xf32>, vector<2x16xf32> -> vector<2x16xf32>
    %c0_7 = arith.constant 0 : index
    %c0_8 = arith.constant 0 : index
    %c0_9 = arith.constant 0 : index
    %5 = vector.load %arg4[%c0_7, %c0_8, %c0_9] : memref<1x1x16xf32, #tpu.memory_space<vmem>>, vector<1x1x16xf32>
    %6 = vector.shape_cast %5 : vector<1x1x16xf32> to vector<1x16xf32>
    %7 = vector.broadcast %6 : vector<1x16xf32> to vector<2x16xf32>
    %8 = arith.addf %4, %7 : vector<2x16xf32>
    %9 = vector.extract_strided_slice %8 {offsets = [0, 0], sizes = [2, 8], strides = [1, 1]} : vector<2x16xf32> to vector<2x8xf32>
    %cst_10 = arith.constant 1.000000e+00 : f32
    %10 = vector.broadcast %cst_10 : f32 to vector<2x8xf32>
    %11 = arith.addf %10, %9 : vector<2x8xf32>
    %12 = vector.extract_strided_slice %8 {offsets = [0, 8], sizes = [2, 8], strides = [1, 1]} : vector<2x16xf32> to vector<2x8xf32>
    %cst_11 = arith.constant dense<0.000000e+00> : vector<8xf32>
    %13 = vector.multi_reduction <add>, %0, %cst_11 [0, 2] : vector<2x8x256xf32> to vector<8xf32>
    %cst_12 = arith.constant 0.001953125 : f32
    %14 = vector.broadcast %cst_12 : f32 to vector<8xf32>
    %15 = arith.mulf %13, %14 : vector<8xf32>
    %16 = arith.mulf %0, %0 : vector<2x8x256xf32>
    %cst_13 = arith.constant dense<0.000000e+00> : vector<8xf32>
    %17 = vector.multi_reduction <add>, %16, %cst_13 [0, 2] : vector<2x8x256xf32> to vector<8xf32>
    %cst_14 = arith.constant 0.001953125 : f32
    %18 = vector.broadcast %cst_14 : f32 to vector<8xf32>
    %19 = arith.mulf %17, %18 : vector<8xf32>
    %20 = arith.mulf %15, %15 : vector<8xf32>
    %21 = arith.subf %19, %20 : vector<8xf32>
    %cst_15 = arith.constant 9.99999974E-6 : f32
    %22 = vector.broadcast %cst_15 : f32 to vector<8xf32>
    %23 = arith.addf %21, %22 : vector<8xf32>
    %24 = math.rsqrt %23 : vector<8xf32>
    %25 = vector.shape_cast %24 : vector<8xf32> to vector<1x8xf32>
    %26 = vector.broadcast %25 : vector<1x8xf32> to vector<2x8xf32>
    %27 = arith.mulf %11, %26 : vector<2x8xf32>
    %28 = vector.shape_cast %15 : vector<8xf32> to vector<1x8xf32>
    %29 = vector.broadcast %28 : vector<1x8xf32> to vector<2x8xf32>
    %30 = arith.mulf %29, %27 : vector<2x8xf32>
    %31 = arith.subf %12, %30 : vector<2x8xf32>
    %32 = vector.shape_cast %27 : vector<2x8xf32> to vector<2x8x1xf32>
    %33 = vector.broadcast %32 : vector<2x8x1xf32> to vector<2x8x256xf32>
    %34 = arith.mulf %0, %33 : vector<2x8x256xf32>
    %35 = vector.shape_cast %31 : vector<2x8xf32> to vector<2x8x1xf32>
    %36 = vector.broadcast %35 : vector<2x8x1xf32> to vector<2x8x256xf32>
    %37 = arith.addf %34, %36 : vector<2x8x256xf32>
    %c0_16 = arith.constant 0 : index
    %c0_17 = arith.constant 0 : index
    %c0_18 = arith.constant 0 : index
    %38 = vector.load %arg5[%c0_16, %c0_17, %c0_18] : memref<2x8x256xf32, #tpu.memory_space<vmem>>, vector<2x8x256xf32>
    tpu.vector_store %arg5[%c0_16, %c0_17, %c0_18], %37 {strides = array<i32>} : memref<2x8x256xf32, #tpu.memory_space<vmem>>, vector<2x8x256xf32>,
    return
  }
  func.func @transform_0(%arg0: i32) -> (i32, i32) {
    %c0_i32 = arith.constant 0 : i32
    %c0_i32_0 = arith.constant 0 : i32
    %c0_i32_1 = arith.constant 0 : i32
    return %c0_i32, %c0_i32_0 : i32, i32
  }
  func.func @transform_1(%arg0: i32) -> (i32, i32, i32) {
    %c0_i32 = arith.constant 0 : i32
    %c0_i32_0 = arith.constant 0 : i32
    %c0_i32_1 = arith.constant 0 : i32
    return %c0_i32, %arg0, %c0_i32_0 : i32, i32, i32
  }
  func.func @transform_2(%arg0: i32) -> (i32, i32, i32) {
    %c0_i32 = arith.constant 0 : i32
    %c0_i32_0 = arith.constant 0 : i32
    %c0_i32_1 = arith.constant 0 : i32
    return %arg0, %c0_i32, %c0_i32_0 : i32, i32, i32
  }
  func.func @transform_3(%arg0: i32) -> (i32, i32, i32) {
    %c0_i32 = arith.constant 0 : i32
    %c0_i32_0 = arith.constant 0 : i32
    %c0_i32_1 = arith.constant 0 : i32
    return %arg0, %c0_i32, %c0_i32_0 : i32, i32, i32
  }
  func.func @transform_4(%arg0: i32) -> (i32, i32, i32) {
    %c0_i32 = arith.constant 0 : i32
    %c0_i32_0 = arith.constant 0 : i32
    %c0_i32_1 = arith.constant 0 : i32
    return %c0_i32, %arg0, %c0_i32_0 : i32, i32, i32
  }
}

</mosaic_0001>

<bundles_post_ra>
// kernel: tpu_custom_call.1
= control target key start
LH: loop header
LB: loop body
LE: loop exit
PB: predicated region body
PF: predicated region fallthrough
CT: control target
= control target key end

     0   :  { %s1176_s0 = inlined_call_operand.hbm [shape: f32[2,8], index: 0, kind: input, shape index: {}]   ;;  %s1177_s1 = inlined_call_operand.hbm [shape: f32[2,16,256], index: 1, kind: input, shape index: {}]   ;;  %s1178_s2 = inlined_call_operand.hbm [shape: f32[2,8,16], index: 2, kind: input, shape index: {}]   ;;  %s1179_s3 = inlined_call_operand.vmem [shape: f32[2,1,16], index: 3, kind: input, shape index: {}]   ;;  %s1180_s4 = inlined_call_operand.hbm [shape: f32[2,16,256], index: 4, kind: output, shape index: {}]  }
   0x1   :  { %1188 = sst [smem:[#allocation12_spill]] %s1177_s1 }
   0x2   :  { %9 = vsyncpa [#allocation3], 0 }
   0x3   :  { %10 = vsyncpa [#allocation6], 0 }
   0x4   :  { %12 = vsyncpa [#allocation6 + $0x1], 0 }
   0x5   :  { %13 = vsyncpa [#allocation4], 0 }
   0x6   :  { %15 = vsyncpa [#allocation4 + $0x1], 0  ;;  %s907_s15 = smov 0   ;;  %s909_s16 = smov 0  }
   0x7   :  { %s911_s17 = smov 0   ;;  %s913_s18 = smov 0  }
   0x8 LB: > { %s928_s19 = sadd.s32 1, %s867_s18   ;;  %s49_s20 = sadd.s32 1, %s863_s17  ;;  %s867_s18 = sphi %s913_s18, %s1209_s18   ;;  %s863_s17 = sphi %s911_s17, %s1208_s17   ;;  %s859_s16 = sphi %s909_s16, %s1207_s16   ;;  %s855_s15 = sphi %s907_s15, %s1206_s15  }
   0x9   : > { %s46_s21 = ssub.s32 %s867_s18, %s928_s19  ;;  %p56_p0 = scmp.ne.s32.totalorder %s863_s17, %s859_s16 }
   0xa   : > { %p47_p1 = scmp.eq.s32.totalorder %s46_s21, 0  ;;  %p57_p2 = scmp.eq.s32.totalorder %s867_s18, 0 }
   0xb   : > { %p660_p4 = scmp.lt.s32.totalorder %s867_s18, 2  ;;  %s175_s23 = sand.u32 1, %s867_s18  }
   0xc   : > { %s939_s22 = scalar_select %p47_p1, %s863_s17, %s49_s20  }
   0xd   : > { %p58_p5 = por %p57_p2, %p56_p0  ;;  %s177_s24 = sand.u32 1, %s863_s17  }
   0xe   : > { %s608_s25 = sshll.u32 %s177_s24, 5  ;;  %s625_s26 = sshll.u32 %s867_s18, 8 }
   0xf   : > { %s1189_s1 = sld [smem:[#allocation12_spill]]  ;;  %s179_s30 = scalar_lea.vmem [#allocation5], %s608_s25 }
  0x10   : > { %s186_s5 = sshll.u32 %s179_s30, 4  ;;  %p954_p6 = pnand %p660_p4, %p58_p5  ;;  %s958_s5 = int_to_ptr.vmem [resolvable:$true] %s186_s5 }
  0x11   : > { %s960_s7 = scalar_lea.sflag [#allocation6], %s175_s23 }
  0x12   : > { %s1190_s6 = scalar_select %p954_p6, 1, 0 }
  0x13   : > { %p1182_p8 = pneg %p954_p6 }
  0x15   : > { %s952_s29 = scalar_lea.hbm %s1189_s1, %s625_s26  ;;  %s714_s11 = scalar_lea.hbm %s1189_s1, 1024 }
  0x16   : > { %s709_s8 = scalar_lea.hbm %s952_s29, 512  ;;  %p715_p11 = scmp.lt.u32.totalorder %s952_s29, %s1189_s1 }
  0x17   : > { %p710_p7 = scmp.ne.s32.totalorder %s952_s29, %s709_s8  ;;  %p716_p12 = scmp.lt.u32.totalorder %s714_s11, %s709_s8 }
  0x18   : > { %p718_p1 = scmp.lt.u32.totalorder %s709_s8, %s952_s29 }
  0x19   : > { %p712_p9 = pnand %p1182_p8, %p710_p7  ;;  %p717_p13 = por %p716_p12, %p715_p11 }
  0x1b   : > { %p713_p10 = pneg %p712_p9  ;;  %p719_p2 = por %p718_p1, %p717_p13 }
  0x1d   : > { %p720_p4 = pnand %p719_p2, %p713_p10 }
  0x1f   : > { %723 = shalt.err (!%p720_p4)
}
  0x20   : > { %s724_s14 = scalar_lea.vmem %s958_s5, 512  ;;  %s869_s20 = smov [#allocation5]  }
  0x21   : > { %p725_p5 = scmp.ne.s32.totalorder %s958_s5, %s724_s14  ;;  %s729_s21 = sshll.u32 %s869_s20, 4  ;;  %s730_s21 = int_to_ptr.vmem [resolvable:$false] %s729_s21 }
  0x22   : > { %s731_s23 = scalar_lea.vmem %s730_s21, 1024  ;;  %p732_p3 = scmp.lt.s32.totalorder %s958_s5, %s730_s21 }
  0x23   : > { %p727_p7 = pnand %p725_p5, %p1182_p8  ;;  %p733_p11 = scmp.lt.s32.totalorder %s731_s23, %s724_s14 }
  0x25   : > { %p728_p9 = pneg %p727_p7  ;;  %p734_p12 = por %p733_p11, %p732_p3 }
  0x27   : > { %p735_p13 = pnand %p734_p12, %p728_p9 }
  0x29   : > { %738 = shalt.err (!%p735_p13)
}
  0x2a   : > { %s870_s25 = smov 512   ;;  %s871_s26 = smov 256  }
  0x2b   : > { %s872_s27 = smov 16   ;;  %s989_s28 = sadd.s32 4294967295, %s867_s18  }
  0x2c   : > { %651 = dma.hbm_to_vmem [thread:$0]  (!%p954_p6), %s952_s29, 512, %s958_s5, %s960_s7, %s870_s25, %s871_s26, %s872_s27  }
  0x2d   : > { %s604_s30 = sadd.s32 4294967294, %s867_s18   ;;  %p62_p3 = scmp.ne.s32.totalorder %s859_s16, %s855_s15 }
  0x2e   : > { %p1181_p10 = scmp.eq.s32.totalorder %s989_s28, 0  ;;  %p138_p1 = scmp.eq.s32.totalorder %s989_s28, 1 }
  0x2f   : > { %p144_p2 = scmp.eq.s32.totalorder %s604_s30, 1  ;;  %p605_p4 = scmp.ge.s32.totalorder %s867_s18, 1 }
  0x30   : > { %p999_p5 = por %p1181_p10, %p62_p3  ;;  %p1006_p7 = por %p138_p1, %p56_p0 }
  0x31   : > { %p1010_p9 = por %p144_p2, %p62_p3  ;;  %p151_p11 = scmp.lt.s32.totalorder %s867_s18, 3 }
  0x32   : > { %s1191_s8 = scalar_select %p999_p5, 1, 0 }
  0x33   : > { %s1192_s29 = scalar_select %p1006_p7, 1, 0 }
  0x34   : > { %s1193_s5 = scalar_select %p1010_p9, 1, 0 }
  0x35   : > { %p1015_p12 = pnand %p605_p4, %p151_p11  ;;  %s873_s10 = smov [#allocation2]  }
  0x36   : > { %s164_s11 = sshll.u32 %s873_s10, 4  ;;  %s611_s12 = sshll.u32 %s177_s24, 3  ;;  %s165_s11 = int_to_ptr.vmem [resolvable:$true] %s164_s11 }
  0x37   : > { %s1194_s9 = scalar_select %p1015_p12, 1, 0 }
  0x38   : > { %p644_p13 = pneg %p1015_p12  ;;  %s612_s13 = sshll.u32 %s867_s18, 7 }
  0x39   : > { %s200_s14 = scalar_lea.vmem [#allocation7], %s611_s12  ;;  %s1033_s26 = scalar_lea.hbm %s1178_s2, %s612_s13 }
  0x3a   : > { %s207_s20 = sshll.u32 %s200_s14, 4  ;;  %p1026_p0 = pnand %p644_p13, %p1181_p10  ;;  %s1035_s20 = int_to_ptr.vmem [resolvable:$true] %s207_s20 }
  0x3b   : > { %s739_s30 = scalar_lea.hbm %s1176_s0, 32 }
  0x3c   : > { %p740_p3 = scmp.ne.s32.totalorder %s1176_s0, %s739_s30  ;;  %p741_p1 = pneg %p1026_p0 }
  0x3d   : > { %p746_p11 = scmp.lt.u32.totalorder %s739_s30, %s1176_s0 }
  0x3e   : > { %p742_p2 = pnand %p741_p1, %p740_p3 }
  0x40   : > { %p743_p4 = pneg %p742_p2 }
  0x42   : > { %p748_p13 = pnand %p746_p11, %p743_p4 }
  0x44   : > { %751 = shalt.err (!%p748_p13)
}
  0x45   : > { %s752_s13 = scalar_lea.vmem %s165_s11, 32  ;;  %p760_p7 = scmp.lt.s32.totalorder %s165_s11, %s165_s11 }
  0x46   : > { %p753_p10 = scmp.ne.s32.totalorder %s165_s11, %s752_s13  ;;  %p761_p5 = scmp.lt.s32.totalorder %s752_s13, %s752_s13 }
  0x48   : > { %p755_p8 = pnand %p753_p10, %p741_p1  ;;  %p762_p12 = por %p761_p5, %p760_p7 }
  0x4a   : > { %p756_p9 = pneg %p755_p8 }
  0x4c   : > { %p763_p6 = pnand %p762_p12, %p756_p9 }
  0x4e   : > { %766 = shalt.err (!%p763_p6)
}
  0x4f   : > { %647 = dma.hbm_to_vmem [thread:$0]  (!%p1026_p0), %s1176_s0, 32, %s165_s11, [#allocation3]  }
  0x50   : > { %s767_s1 = scalar_lea.hbm %s1033_s26, 128  ;;  %p1196_p10 = scmp.ne.s32.totalorder %s1190_s6, 0 }
  0x51   : > { %p768_p3 = scmp.ne.s32.totalorder %s1033_s26, %s767_s1  ;;  %s772_s30 = scalar_lea.hbm %s1178_s2, 256 }
  0x52   : > { %p1197_p8 = pneg %p1196_p10  ;;  %p773_p6 = scmp.lt.u32.totalorder %s1033_s26, %s1178_s2 }
  0x53   : > { %p774_p5 = scmp.lt.u32.totalorder %s772_s30, %s767_s1  ;;  %p776_p9 = scmp.lt.u32.totalorder %s767_s1, %s1033_s26 }
  0x54   : > { %p770_p1 = pnand %p768_p3, %p1197_p8 }
  0x55   : > { %p775_p7 = por %p774_p5, %p773_p6 }
  0x56   : > { %p771_p2 = pneg %p770_p1 }
  0x57   : > { %p777_p12 = por %p776_p9, %p775_p7 }
  0x59   : > { %p778_p4 = pnand %p777_p12, %p771_p2 }
  0x5b   : > { %781 = shalt.err (!%p778_p4)
}
  0x5c   : > { %s782_s11 = scalar_lea.vmem %s1035_s20, 128  ;;  %p1198_p11 = pmov %p1197_p8 }
  0x5d   : > { %p783_p0 = scmp.ne.s32.totalorder %s1035_s20, %s782_s11  ;;  %s874_s12 = smov [#allocation7]  }
  0x5e   : > { %s787_s14 = sshll.u32 %s874_s12, 4  ;;  %s788_s14 = int_to_ptr.vmem [resolvable:$false] %s787_s14 }
  0x5f   : > { %p785_p13 = pnand %p783_p0, %p1198_p11  ;;  %s789_s13 = scalar_lea.vmem %s788_s14, 256 }
  0x60   : > { %p790_p8 = scmp.lt.s32.totalorder %s1035_s20, %s788_s14  ;;  %p791_p1 = scmp.lt.s32.totalorder %s789_s13, %s782_s11 }
  0x61   : > { %p786_p3 = pneg %p785_p13 }
  0x62   : > { %p792_p6 = por %p791_p1, %p790_p8 }
  0x64   : > { %p793_p5 = pnand %p792_p6, %p786_p3 }
  0x66   : > { %796 = shalt.err (!%p793_p5)
}
  0x67   : > { %654 = dma.hbm_to_vmem [thread:$0]  (!%p1196_p10), %s1033_s26, 128, %s1035_s20, %s960_s7  }
  0x68   : > { %p1199_p2 = scmp.ne.s32.totalorder %s1194_s9, 0 }
  0x69   : > { %p1200_p7 = scmp.eq.s32.totalorder (!%p1199_p2), %s989_s28, 0 }
  0x6a   : > { %222 = sbr.rel (%p1199_p2) target bundleno = 736 (0x2e0), region = 36 }
  0x71   : > { %842 = dma.done.wait (%p1200_p7), [#allocation3], 32   ;;  %p1201_p9 = pmov %p1200_p7 }
  0x72   : > { %s228_s23 = sand.u32 1, %s989_s28   ;;  %s1085_s25 = sand.u32 1, %s859_s16  }
  0x73   : > { %844 = vsyncadd (%p1201_p9), [#allocation3], 4294967264  ;;  %s615_s6 = sshll.u32 %s1085_s25, 5  ;;  %s229_s1 = scalar_lea.sflag [#allocation6], %s228_s23 }
  0x74   : > { %s232_s7 = scalar_lea.vmem [#allocation5], %s615_s6  ;;  %p1202_p10 = scmp.ne.s32.totalorder %s1191_s8, 0 }
  0x76   : > { %846 = dma.done.wait (%p1202_p10), %s229_s1, 640  }
  0x77   : > { %848 = vsyncadd (%p1202_p10), %s229_s1, 4294966656  ;;  %v875_v0 = vmov 0.0   ;;  %s616_s9 = sshll.u32 %s1085_s25, 3  ;;  %vm876_vm0 = vmmov 0   ;;  %vm290_vm1 = vcmask 64512   ;;  %v1095_v3 = vld [vmem:[%s232_s7] sm:$0xff]  ;;  %v386_v24 = vlaneseq }
  0x78   : > { %629 = vmatprep.subr.mxu0 %v875_v0  ;;  %631 = vmatprep.mubr.msk.f32.mxu0 %vm876_vm0, %v875_v0  ;;  %s241_s20 = scalar_lea.vmem [#allocation7], %s616_s9  ;;  %v281_v2 = vld [vmem:[#allocation2] sm:$0x3]  ;;  %v1097_v4 = vld [vmem:[%s232_s7 + $0x8] sm:$0xff]  ;;  %v1099_v5 = vld [vmem:[%s232_s7 + $0x10] sm:$0xff]  ;;  %v371_v6 = vmul.f32 %v1095_v3, %v1095_v3  ;;  %p274_p12 = scmp.lt.s32.totalorder %s989_s28, 1 }
  0x79   : > { %v282_v1 = vld [vmem:[%s241_s20] sm:$0xff]  ;;  %v365_v7 = vadd.f32 %v1097_v4, %v1095_v3  ;;  %v372_v8 = vmul.f32 %v1097_v4, %v1097_v4  ;;  %v373_v9 = vmul.f32 %v1099_v5, %v1099_v5  ;;  %v1109_v10 = vld [vmem:[%s232_s7 + $0x18] sm:$0xff]  ;;  %v387_v25 = vand.u32 127, %v386_v24  ;;  %s273_s30 = scalar_lea.vmem [#allocation8], %s615_s6  ;;  %s626_s10 = sshll.u32 %s989_s28, 8 }
  0x7a   : > { %630 = vmatpush3.msra.mxu0 %v282_v1  ;;  %v374_v12 = vmul.f32 %v1109_v10, %v1109_v10  ;;  %s275_s8 = scalar_select %p274_p12, %s989_s28, 1  ;;  %v389_v26 = vshrl.u32 %v386_v24, 7  ;;  %v877_v27 = vmov 0   ;;  %vm392_vm2 = vcmask 1041409  }
  0x7b   : > { %632 = vmatmul.mubr.msk.f32.vlgmr.msra.gmra.mrb[0].mxu0 %vm290_vm1, %v281_v2  ;;  %v366_v11 = vadd.f32 %v365_v7, %v1099_v5  ;;  %v375_v13 = vadd.f32 %v372_v8, %v371_v6  ;;  %705 = vset.pattern.permute.xlu0 %v877_v27  ;;  %v422_v45 = vadd.s32 4294967288, %v387_v25  ;;  %s490_s21 = sshll.u32 %s273_s30, 4  ;;  %s1132_s14 = scalar_lea.hbm %s1180_s4, %s626_s10  ;;  %s1127_s21 = int_to_ptr.vmem [resolvable:$true] %s490_s21 }
  0x7c   : > { %s276_s27 = scalar_lea.vmem %s1179_s3, %s275_s8  ;;  %706 = vset.pattern.permute.xlu1 %v877_v27  ;;  %v390_v29 = vsub.s32 %v387_v25, %v389_v26  ;;  %v398_v36 = vsub.s32 0, %v389_v26  ;;  %v405_v39 = vsub.s32 1, %v389_v26  ;;  %s477_s28 = scalar_lea.sflag [#allocation4], %s1085_s25 }
  0x7d   : > { %v367_v14 = vadd.f32 %v366_v11, %v1109_v10  ;;  %v376_v15 = vadd.f32 %v375_v13, %v373_v9  ;;  %v618_v28 = vld [vmem:[%s276_s27] ss:$0 sm:$0xff]  ;;  %v425_v46 = vsub.s32 %v422_v45, %v389_v26  ;;  %s797_s13 = scalar_lea.vmem %s1127_s21, 512  ;;  %p1203_p0 = scmp.ne.s32.totalorder %s1192_s29, 0 }
  0x7e   : > { %p798_p4 = scmp.ne.s32.totalorder %s1127_s21, %s797_s13  ;;  %s878_s23 = smov [#allocation8]  }
  0x7f   : > { %368 = vadd.xlane.f32.xlu0 %v367_v14  ;;  %v377_v16 = vadd.f32 %v376_v15, %v374_v12  ;;  %s801_s6 = sshll.u32 %s878_s23, 4  ;;  %s802_s6 = int_to_ptr.vmem [resolvable:$false] %s801_s6 }
  0x80   : > { %p799_p11 = pnand %p798_p4, %p1203_p0  ;;  %s803_s1 = scalar_lea.vmem %s802_s6, 1024 }
  0x81   : > { %p804_p3 = scmp.lt.s32.totalorder %s1127_s21, %s802_s6  ;;  %p805_p8 = scmp.lt.s32.totalorder %s803_s1, %s797_s13 }
  0x82   : > { %p800_p13 = pneg %p799_p11 }
  0x83   : > { %378 = vadd.xlane.f32.xlu0 %v377_v16  ;;  %p806_p1 = por %p805_p8, %p804_p3 }
  0x85   : > { %p807_p6 = pnand %p806_p1, %p800_p13 }
 0x10c   : > { %v369_v17 = vpop.xlane.xlu0 %368 }
 0x10d   : > { %v370_v18 = vmul.f32 0.001953125, %v369_v17 }
 0x10f   : > { %v381_v20 = vmul.f32 %v370_v18, %v370_v18 }
 0x110   : > { %v379_v19 = vpop.xlane.xlu0 %378 }
 0x111   : > { %v380_v21 = vmul.f32 0.001953125, %v379_v19 }
 0x113   : > { %v382_v22 = vsub.f32 %v380_v21, %v381_v20 }
 0x115   : > { %v383_v23 = vadd.f32 1e-05, %v382_v22 }
 0x117   : > { %707 = vrsqrt.f32 %v383_v23 }
 0x121   : > { %v708_v30 = vpop.eup %707 }
 0x122   : > { %v391_v35 = vrot.slane %v708_v30, %v390_v29 }
 0x14e   : > { %v360_v31 = vpop.f32.mrb[0].mxu0 }
 0x14f   : > { %v361_v32 = vadd.f32 %v618_v28, %v360_v31  ;;  %v633_v33 = vpop.f32.mrb[1].mxu0 }
 0x151   : > { %v364_v34 = vadd.f32 1.0, %v361_v32 }
 0x153   : > { %v394_v37 = vmul.f32 %v391_v35, %v364_v34 }
 0x155   : > { %v399_v38 = vrot.slane %v394_v37, %v398_v36  ;;  %v406_v40 = vrot.slane %v394_v37, %v405_v39 }
 0x157   : > { %401 = vbcast.lane.b32.xlu1 %v399_v38, 256 }
 0x15b   : > { %408 = vbcast.lane.b32.xlu1 %v406_v40, 256 }
 0x1c9   : > { %v402_v41 = vpop.permute.xlu1 %401 }
 0x1ca   : > { %v412_v42 = vmul.f32 %v402_v41, %v370_v18 }
 0x1cc   : > { %417 = vperm.xlu0 %705, %v412_v42  }
 0x1cd   : > { %v409_v43 = vpop.permute.xlu1 %408 }
 0x1ce   : > { %v413_v44 = vmul.f32 %v409_v43, %v370_v18 }
 0x1d0   : > { %420 = vperm.xlu1 %706, %v413_v44  }
 0x1d4   : > { %439 = vbcast.lane.b32.xlu1 %v399_v38, 256 }
 0x1d8   : > { %446 = vbcast.lane.b32.xlu1 %v406_v40, 256 }
 0x24b   : > { %v418_v47 = vpop.permute.xlu0 %417 }
 0x24c   : > { %v426_v49 = vrot.slane %v418_v47, %v425_v46 }
 0x24f   : > { %v421_v48 = vpop.permute.xlu1 %420 }
 0x250   : > { %v430_v50 = vrot.slane %v421_v48, %v425_v46 }
 0x252   : > { %v431_v51 = vsel %vm392_vm2, %v430_v50, %v426_v49 }
 0x253   : > { %v433_v52 = vsub.f32 %v361_v32, %v431_v51  ;;  %v440_v55 = vpop.permute.xlu1 %439 }
 0x254   : > { %v448_v57 = vmul.f32 %v440_v55, %v1095_v3  ;;  %v449_v58 = vmul.f32 %v440_v55, %v1097_v4 }
 0x255   : > { %v455_v53 = vrot.slane %v433_v52, %v398_v36  ;;  %v463_v54 = vrot.slane %v433_v52, %v405_v39 }
 0x257   : > { %458 = vbcast.lane.b32.xlu1 %v455_v53, 264  ;;  %v447_v56 = vpop.permute.xlu1 %446 }
 0x258   : > { %v450_v62 = vmul.f32 %v447_v56, %v1099_v5  ;;  %v451_v63 = vmul.f32 %v447_v56, %v1109_v10 }
 0x25b   : > { %466 = vbcast.lane.b32.xlu1 %v463_v54, 264 }
 0x2c9   : > { %v459_v59 = vpop.permute.xlu1 %458 }
 0x2ca   : > { %v468_v60 = vadd.f32 %v459_v59, %v448_v57  ;;  %v469_v61 = vadd.f32 %v459_v59, %v449_v58 }
 0x2cc   : > { %472 = vst [vmem:[%s273_s30] sm:$0xff] %v468_v60  ;;  %473 = vst [vmem:[%s273_s30 + $0x8] sm:$0xff] %v469_v61 }
 0x2cd   : > { %v467_v0 = vpop.permute.xlu1 %466 }
 0x2ce   : > { %v470_v1 = vadd.f32 %v467_v0, %v450_v62  ;;  %v471_v2 = vadd.f32 %v467_v0, %v451_v63 }
 0x2d0   : > { %474 = vst [vmem:[%s273_s30 + $0x10] sm:$0xff] %v470_v1  ;;  %475 = vst [vmem:[%s273_s30 + $0x18] sm:$0xff] %v471_v2 }
 0x2d1   : > { %810 = shalt.err (!%p807_p6)
}
 0x2d2   : > { %s811_s7 = scalar_lea.hbm %s1132_s14, 512  ;;  %s815_s8 = scalar_lea.hbm %s1180_s4, 1024 }
 0x2d3   : > { %p812_p5 = scmp.ne.s32.totalorder %s1132_s14, %s811_s7  ;;  %p816_p9 = scmp.lt.u32.totalorder %s1132_s14, %s1180_s4 }
 0x2d4   : > { %p817_p10 = scmp.lt.u32.totalorder %s815_s8, %s811_s7  ;;  %p819_p4 = scmp.lt.u32.totalorder %s811_s7, %s1132_s14 }
 0x2d5   : > { %p813_p2 = pnand %p812_p5, %p1203_p0 }
 0x2d6   : > { %p818_p12 = por %p817_p10, %p816_p9 }
 0x2d7   : > { %p814_p7 = pneg %p813_p2 }
 0x2d8   : > { %p820_p11 = por %p819_p4, %p818_p12 }
 0x2da   : > { %p821_p13 = pnand %p820_p11, %p814_p7 }
 0x2dc   : > { %824 = shalt.err (!%p821_p13)
}
 0x2dd   : > { %s879_s27 = smov 256   ;;  %s880_s30 = smov 512  }
 0x2de   : > { %s881_s10 = smov 16  }
 0x2df   : > { %642 = dma.vmem_to_hbm [thread:$0]  (%p1203_p0), %s1127_s21, 512, %s1132_s14, %s477_s28, %s879_s27, %s880_s30, %s881_s10  }
 0x2e0 PF: > { %s505_s11 = sand.u32 1, %s855_s15   ;;  %p1204_p3 = scmp.ne.s32.totalorder %s1193_s5, 0 }
 0x2e1   : > { %p1205_p8 = scmp.ge.s32.totalorder %s867_s18, 2  ;;  %s506_s12 = scalar_lea.sflag [#allocation4], %s505_s11 }
 0x2e3   : > { %p656_p1 = pnand %p1205_p8, %p1204_p3 }
 0x2e5   : > { %850 = dma.done.wait (!%p656_p1), %s506_s12, 512  }
 0x2e6   : > { %852 = vsyncadd (!%p656_p1), %s506_s12, 4294966784  ;;  %p18_p6 = scmp.ge.s32.totalorder %s928_s19, 4   ;;  %s1206_s15 = smov %s859_s16 }
 0x2e7   : > { %s1207_s16 = smov %s863_s17  ;;  %s1208_s17 = smov %s939_s22 }
 0x2e8   : > { %s1209_s18 = smov %s928_s19  ;;  %20 = sbr.rel (!%p18_p6) target bundleno = 8 (0x8), region = 100 }
 0x2ef   :  { %511 = vsyncpa [#allocation3], 1 }
 0x2f0   :  { %513 = vsyncpa [#allocation3 + $0x1], 1 }
 0x2f1   :  { %514 = vsyncpa [#allocation6], 1 }
 0x2f2   :  { %516 = vsyncpa [#allocation6 + $0x1], 1 }
 0x2f3   :  { %517 = vsyncpa [#allocation4], 1 }
 0x2f4   :  { %519 = vsyncpa [#allocation4 + $0x1], 1 }

</bundles_post_ra>
